<compile_context>
chip_gen: v7x
topology: tpu7x:2x2x1
jax: 0.10.0
libtpu: 0.0.40
codegen_flags: <defaults>
</compile_context>

<pallas_src>
import functools
import math

import jax
import jax.numpy as jnp
from jax import lax
from jax.experimental import pallas as pl
from jax.experimental.pallas import tpu as pltpu

LN_EPS = 1e-5                      # torch.nn.LayerNorm default
_SQRT_HALF = 1.0 / math.sqrt(2.0)


def _round_up(v, m):
    return ((v + m - 1) // m) * m


def _mlp_kernel(x_ref, gamma_ref, beta_ref, w1_ref, b1_ref, w2_ref, b2_ref,
                o_ref, *, inv_d):
    # ---- LayerNorm over the (padded) lane axis, one-pass statistics ----
    # inv_d = 1 / D_original; zero-padded lanes contribute 0 to both sums,
    # and gamma/beta are zero-padded so padded lanes of xn are exactly 0.
    x = x_ref[...]
    if x.dtype != jnp.float32:
        x = x.astype(jnp.float32)
    s1 = jnp.sum(x, axis=-1, keepdims=True)
    s2 = jnp.sum(x * x, axis=-1, keepdims=True)
    mu = s1 * inv_d
    var = jnp.maximum(s2 * inv_d - mu * mu, 0.0)
    xn = (x - mu) * lax.rsqrt(var + LN_EPS)
    xn = xn * gamma_ref[...] + beta_ref[...]

    # ---- fc1: bf16 operands -> MXU, f32 accumulate; exact (erf) GELU ----
    h = jnp.dot(xn.astype(jnp.bfloat16), w1_ref[...],
                preferred_element_type=jnp.float32) + b1_ref[...]
    h = 0.5 * h * (1.0 + lax.erf(h * _SQRT_HALF))

    # ---- fc2: bf16 operands -> MXU, f32 accumulate ----
    y = jnp.dot(h.astype(jnp.bfloat16), w2_ref[...],
                preferred_element_type=jnp.float32) + b2_ref[...]
    o_ref[...] = y.astype(o_ref.dtype)


def mlp_pallas(x, gamma, beta, w1, b1, w2, b2, *, tm_max=256):
    """x: (B, S, D). Returns (B, S, D_out)."""
    B, S, D = x.shape
    H = w1.shape[1]
    Do = w2.shape[1]
    M = B * S

    # Lane-dense padding of feature dims (multiples of 128).
    Dp = _round_up(D, 128)
    Hp = _round_up(H, 128)
    Dop = _round_up(Do, 128)

    x2 = x.reshape(M, D)
    if Dp != D:
        x2 = jnp.pad(x2, ((0, 0), (0, Dp - D)))
    gamma_p = jnp.pad(gamma.astype(jnp.float32), (0, Dp - D)).reshape(1, Dp)
    beta_p = jnp.pad(beta.astype(jnp.float32), (0, Dp - D)).reshape(1, Dp)
    w1_p = jnp.pad(w1, ((0, Dp - D), (0, Hp - H))).astype(jnp.bfloat16)
    b1_p = jnp.pad(b1.astype(jnp.float32), (0, Hp - H)).reshape(1, Hp)
    w2_p = jnp.pad(w2, ((0, Hp - H), (0, Dop - Do))).astype(jnp.bfloat16)
    b2_p = jnp.pad(b2.astype(jnp.float32), (0, Dop - Do)).reshape(1, Dop)

    # Row tile: multiple of 8, capped so the f32 (tm, Hp) intermediate plus
    # weights fit comfortably inside v7x's 64 MiB VMEM.  Partial last blocks
    # are handled by Pallas (masked writes); the math is row-independent.
    tm = min(tm_max, _round_up(M, 8))
    grid = (pl.cdiv(M, tm),)

    # Explicit scoped-VMEM budget (double-buffered x/out tiles, weight copies,
    # f32 intermediates) — capped below v7x's 64 MiB physical VMEM.
    itemsize_in = jnp.dtype(x.dtype).itemsize
    est = (2 * tm * Dp * itemsize_in            # x tiles (double-buffered)
           + 2 * tm * Dop * itemsize_in         # out tiles (double-buffered)
           + 2 * (Dp * Hp + Hp * Dop) * 2       # bf16 weights (worst-case 2 buffers)
           + 4 * (2 * Dp + Hp + Dop) * 4        # gamma/beta/biases
           + 3 * tm * Hp * 4)                   # f32 intermediates headroom
    vmem_limit = int(min(max(2 * est, 16 << 20), 48 << 20))

    # NOTE: weight/bias/gamma/beta specs have constant index_maps, so their
    # tiles are fetched once and stay resident across the row grid.
    # (pipeline_mode=pl.Buffered(1) would halve their VMEM footprint further;
    # left at the default for broad JAX-version compatibility.)
    # For very large H (e.g. 4x expansion at D>=2048) a second "arbitrary"
    # grid axis splitting H with a (tm, D_out) f32 accumulator would cap the
    # (tm, H) intermediate; unnecessary at these sizes.
    out = pl.pallas_call(
        functools.partial(_mlp_kernel, inv_d=1.0 / D),
        out_shape=jax.ShapeDtypeStruct((M, Dop), x.dtype),
        grid_spec=pltpu.PrefetchScalarGridSpec(
            num_scalar_prefetch=0,
            grid=grid,
            in_specs=[
                pl.BlockSpec((tm, Dp), lambda i: (i, 0)),       # x rows
                pl.BlockSpec((1, Dp), lambda i: (0, 0)),        # ln gamma
                pl.BlockSpec((1, Dp), lambda i: (0, 0)),        # ln beta
                pl.BlockSpec((Dp, Hp), lambda i: (0, 0)),       # w1 (bf16)
                pl.BlockSpec((1, Hp), lambda i: (0, 0)),        # b1
                pl.BlockSpec((Hp, Dop), lambda i: (0, 0)),      # w2 (bf16)
                pl.BlockSpec((1, Dop), lambda i: (0, 0)),       # b2
            ],
            out_specs=pl.BlockSpec((tm, Dop), lambda i: (i, 0)),
        ),
        compiler_params=pltpu.CompilerParams(
            dimension_semantics=("parallel",),
            vmem_limit_bytes=vmem_limit,
        ),
    )(x2, gamma_p, beta_p, w1_p, b1_p, w2_p, b2_p)

    return out[:, :Do].reshape(B, S, Do)


def init_mlp_params(key, in_features, hidden_features, out_features, dtype=jnp.float32):
    """Deterministic init mirroring the torch module's _init_weights:
       xavier_uniform weights, uniform(-1/sqrt(fan_in), 1/sqrt(fan_in)) biases,
       LayerNorm gamma=1, beta=0.  Weights stored as (in, out) (transposed vs torch)."""
    k1, k2, k3, k4 = jax.random.split(key, 4)

    limit1 = math.sqrt(6.0 / (in_features + hidden_features))
    w1 = jax.random.uniform(k1, (in_features, hidden_features), dtype,
                            minval=-limit1, maxval=limit1)
    bound1 = 1.0 / math.sqrt(in_features)
    b1 = jax.random.uniform(k2, (hidden_features,), dtype,
                            minval=-bound1, maxval=bound1)

    limit2 = math.sqrt(6.0 / (hidden_features + out_features))
    w2 = jax.random.uniform(k3, (hidden_features, out_features), dtype,
                            minval=-limit2, maxval=limit2)
    bound2 = 1.0 / math.sqrt(hidden_features)
    b2 = jax.random.uniform(k4, (out_features,), dtype,
                            minval=-bound2, maxval=bound2)

    gamma = jnp.ones((in_features,), dtype)
    beta = jnp.zeros((in_features,), dtype)
    return gamma, beta, w1, b1, w2, b2


def mlp_ref(x, gamma, beta, w1, b1, w2, b2):
    """Pure-JAX f32 reference for sanity checking."""
    mu = jnp.mean(x, axis=-1, keepdims=True)
    var = jnp.mean((x - mu) ** 2, axis=-1, keepdims=True)
    xn = (x - mu) / jnp.sqrt(var + LN_EPS) * gamma + beta
    h = xn @ w1 + b1
    h = 0.5 * h * (1.0 + lax.erf(h / math.sqrt(2.0)))
    return h @ w2 + b2


if __name__ == "__main__":
    B, S = 2, 8
    in_features = 32
    hidden_features = 64
    out_features = 32   # defaults to in_features in the torch module

    key = jax.random.PRNGKey(0)
    kx, kp = jax.random.split(key)
    x = jax.random.normal(kx, (B, S, in_features), jnp.float32)
    params = init_mlp_params(kp, in_features, hidden_features, out_features)

    y = mlp_pallas(x, *params)
    y = jax.block_until_ready(y)

    y_ref = mlp_ref(x, *params)
    assert y.shape == (B, S, out_features)
    # Tolerance reflects bf16 MXU operands with f32 accumulation.
    assert jnp.allclose(y, y_ref, atol=3e-2, rtol=3e-2), "mismatch vs reference"

    print("KERNEL_OK")
</pallas_src>

<mosaic_0001>
module attributes {stable_mosaic.version = 11 : i64} {
  func.func @_mlp_kernel(%arg0: i32, %arg1: memref<16x128xf32, #tpu.memory_space<vmem>>, %arg2: memref<1x128xf32, #tpu.memory_space<vmem>>, %arg3: memref<1x128xf32, #tpu.memory_space<vmem>>, %arg4: memref<128x128xbf16, #tpu.memory_space<vmem>>, %arg5: memref<1x128xf32, #tpu.memory_space<vmem>>, %arg6: memref<128x128xbf16, #tpu.memory_space<vmem>>, %arg7: memref<1x128xf32, #tpu.memory_space<vmem>>, %arg8: memref<16x128xf32, #tpu.memory_space<vmem>>) attributes {dimension_semantics = [#tpu.dimension_semantics<parallel>], iteration_bounds = array<i64: 1>, scalar_prefetch = 0 : i64, scratch_operands = 0 : i64, tpu.core_type = #tpu.core_type<tc>, window_params = [{transform_indices = @transform_0, window_bounds = array<i64: 16, 128>}, {pipeline_mode = #tpu.pipeline_mode<synchronous>, transform_indices = @transform_1, window_bounds = array<i64: 1, 128>}, {pipeline_mode = #tpu.pipeline_mode<synchronous>, transform_indices = @transform_2, window_bounds = array<i64: 1, 128>}, {pipeline_mode = #tpu.pipeline_mode<synchronous>, transform_indices = @transform_3, window_bounds = array<i64: 128, 128>}, {pipeline_mode = #tpu.pipeline_mode<synchronous>, transform_indices = @transform_4, window_bounds = array<i64: 1, 128>}, {pipeline_mode = #tpu.pipeline_mode<synchronous>, transform_indices = @transform_5, window_bounds = array<i64: 128, 128>}, {pipeline_mode = #tpu.pipeline_mode<synchronous>, transform_indices = @transform_6, window_bounds = array<i64: 1, 128>}, {transform_indices = @transform_7, window_bounds = array<i64: 16, 128>}]} {
    %c0 = arith.constant 0 : index
    %c0_0 = arith.constant 0 : index
    %0 = vector.load %arg1[%c0, %c0_0] : memref<16x128xf32, #tpu.memory_space<vmem>>, vector<16x128xf32>
    %cst = arith.constant dense<0.000000e+00> : vector<16xf32>
    %1 = vector.multi_reduction <add>, %0, %cst [1] : vector<16x128xf32> to vector<16xf32>
    %2 = vector.shape_cast %1 : vector<16xf32> to vector<16x1xf32>
    %3 = arith.mulf %0, %0 : vector<16x128xf32>
    %cst_1 = arith.constant dense<0.000000e+00> : vector<16xf32>
    %4 = vector.multi_reduction <add>, %3, %cst_1 [1] : vector<16x128xf32> to vector<16xf32>
    %5 = vector.shape_cast %4 : vector<16xf32> to vector<16x1xf32>
    %cst_2 = arith.constant 3.125000e-02 : f32
    %6 = vector.broadcast %cst_2 : f32 to vector<16x1xf32>
    %7 = arith.mulf %2, %6 : vector<16x1xf32>
    %cst_3 = arith.constant 3.125000e-02 : f32
    %8 = vector.broadcast %cst_3 : f32 to vector<16x1xf32>
    %9 = arith.mulf %5, %8 : vector<16x1xf32>
    %10 = arith.mulf %7, %7 : vector<16x1xf32>
    %11 = arith.subf %9, %10 : vector<16x1xf32>
    %cst_4 = arith.constant 0.000000e+00 : f32
    %12 = vector.broadcast %cst_4 : f32 to vector<16x1xf32>
    %13 = arith.maximumf %11, %12 : vector<16x1xf32>
    %14 = vector.broadcast %7 : vector<16x1xf32> to vector<16x128xf32>
    %15 = arith.subf %0, %14 : vector<16x128xf32>
    %cst_5 = arith.constant 9.99999974E-6 : f32
    %16 = vector.broadcast %cst_5 : f32 to vector<16x1xf32>
    %17 = arith.addf %13, %16 : vector<16x1xf32>
    %18 = math.rsqrt %17 : vector<16x1xf32>
    %19 = vector.broadcast %18 : vector<16x1xf32> to vector<16x128xf32>
    %20 = arith.mulf %15, %19 : vector<16x128xf32>
    %c0_6 = arith.constant 0 : index
    %c0_7 = arith.constant 0 : index
    %21 = vector.load %arg2[%c0_6, %c0_7] : memref<1x128xf32, #tpu.memory_space<vmem>>, vector<1x128xf32>
    %22 = vector.broadcast %21 : vector<1x128xf32> to vector<16x128xf32>
    %23 = arith.mulf %20, %22 : vector<16x128xf32>
    %c0_8 = arith.constant 0 : index
    %c0_9 = arith.constant 0 : index
    %24 = vector.load %arg3[%c0_8, %c0_9] : memref<1x128xf32, #tpu.memory_space<vmem>>, vector<1x128xf32>
    %25 = vector.broadcast %24 : vector<1x128xf32> to vector<16x128xf32>
    %26 = arith.addf %23, %25 : vector<16x128xf32>
    %27 = arith.truncf %26 : vector<16x128xf32> to vector<16x128xbf16>
    %c0_10 = arith.constant 0 : index
    %c0_11 = arith.constant 0 : index
    %28 = vector.load %arg4[%c0_10, %c0_11] : memref<128x128xbf16, #tpu.memory_space<vmem>>, vector<128x128xbf16>
    %cst_12 = arith.constant dense<0.000000e+00> : vector<16x128xf32>
    %29 = tpu.matmul %27, %28, %cst_12 {dimension_numbers = #tpu.dot_dimension_numbers<[1], [0], [0], [1], [0, 0, 1, 1], [], []>} : vector<16x128xbf16>, vector<128x128xbf16>, vector<16x128xf32> -> vector<16x128xf32>
    %c0_13 = arith.constant 0 : index
    %c0_14 = arith.constant 0 : index
    %30 = vector.load %arg5[%c0_13, %c0_14] : memref<1x128xf32, #tpu.memory_space<vmem>>, vector<1x128xf32>
    %31 = vector.broadcast %30 : vector<1x128xf32> to vector<16x128xf32>
    %32 = arith.addf %29, %31 : vector<16x128xf32>
    %cst_15 = arith.constant 5.000000e-01 : f32
    %33 = vector.broadcast %cst_15 : f32 to vector<16x128xf32>
    %34 = arith.mulf %33, %32 : vector<16x128xf32>
    %cst_16 = arith.constant 0.707106769 : f32
    %35 = vector.broadcast %cst_16 : f32 to vector<16x128xf32>
    %36 = arith.mulf %32, %35 : vector<16x128xf32>
    %37 = math.erf %36 : vector<16x128xf32>
    %cst_17 = arith.constant 1.000000e+00 : f32
    %38 = vector.broadcast %cst_17 : f32 to vector<16x128xf32>
    %39 = arith.addf %38, %37 : vector<16x128xf32>
    %40 = arith.mulf %34, %39 : vector<16x128xf32>
    %41 = arith.truncf %40 : vector<16x128xf32> to vector<16x128xbf16>
    %c0_18 = arith.constant 0 : index
    %c0_19 = arith.constant 0 : index
    %42 = vector.load %arg6[%c0_18, %c0_19] : memref<128x128xbf16, #tpu.memory_space<vmem>>, vector<128x128xbf16>
    %cst_20 = arith.constant dense<0.000000e+00> : vector<16x128xf32>
    %43 = tpu.matmul %41, %42, %cst_20 {dimension_numbers = #tpu.dot_dimension_numbers<[1], [0], [0], [1], [0, 0, 1, 1], [], []>} : vector<16x128xbf16>, vector<128x128xbf16>, vector<16x128xf32> -> vector<16x128xf32>
    %c0_21 = arith.constant 0 : index
    %c0_22 = arith.constant 0 : index
    %44 = vector.load %arg7[%c0_21, %c0_22] : memref<1x128xf32, #tpu.memory_space<vmem>>, vector<1x128xf32>
    %45 = vector.broadcast %44 : vector<1x128xf32> to vector<16x128xf32>
    %46 = arith.addf %43, %45 : vector<16x128xf32>
    %c0_23 = arith.constant 0 : index
    %c0_24 = arith.constant 0 : index
    %47 = vector.load %arg8[%c0_23, %c0_24] : memref<16x128xf32, #tpu.memory_space<vmem>>, vector<16x128xf32>
    tpu.vector_store %arg8[%c0_23, %c0_24], %46 {strides = array<i32>} : memref<16x128xf32, #tpu.memory_space<vmem>>, vector<16x128xf32>,
    return
  }
  func.func @transform_0(%arg0: i32) -> (i32, i32) {
    %c0_i32 = arith.constant 0 : i32
    %c0_i32_0 = arith.constant 0 : i32
    return %arg0, %c0_i32 : i32, i32
  }
  func.func @transform_1(%arg0: i32) -> (i32, i32) {
    %c0_i32 = arith.constant 0 : i32
    %c0_i32_0 = arith.constant 0 : i32
    %c0_i32_1 = arith.constant 0 : i32
    return %c0_i32, %c0_i32_0 : i32, i32
  }
  func.func @transform_2(%arg0: i32) -> (i32, i32) {
    %c0_i32 = arith.constant 0 : i32
    %c0_i32_0 = arith.constant 0 : i32
    %c0_i32_1 = arith.constant 0 : i32
    return %c0_i32, %c0_i32_0 : i32, i32
  }
  func.func @transform_3(%arg0: i32) -> (i32, i32) {
    %c0_i32 = arith.constant 0 : i32
    %c0_i32_0 = arith.constant 0 : i32
    %c0_i32_1 = arith.constant 0 : i32
    return %c0_i32, %c0_i32_0 : i32, i32
  }
  func.func @transform_4(%arg0: i32) -> (i32, i32) {
    %c0_i32 = arith.constant 0 : i32
    %c0_i32_0 = arith.constant 0 : i32
    %c0_i32_1 = arith.constant 0 : i32
    return %c0_i32, %c0_i32_0 : i32, i32
  }
  func.func @transform_5(%arg0: i32) -> (i32, i32) {
    %c0_i32 = arith.constant 0 : i32
    %c0_i32_0 = arith.constant 0 : i32
    %c0_i32_1 = arith.constant 0 : i32
    return %c0_i32, %c0_i32_0 : i32, i32
  }
  func.func @transform_6(%arg0: i32) -> (i32, i32) {
    %c0_i32 = arith.constant 0 : i32
    %c0_i32_0 = arith.constant 0 : i32
    %c0_i32_1 = arith.constant 0 : i32
    return %c0_i32, %c0_i32_0 : i32, i32
  }
  func.func @transform_7(%arg0: i32) -> (i32, i32) {
    %c0_i32 = arith.constant 0 : i32
    %c0_i32_0 = arith.constant 0 : i32
    return %arg0, %c0_i32 : i32, i32
  }
}

</mosaic_0001>

<bundles_post_ra>
// kernel: tpu_custom_call.1
= control target key start
LH: loop header
LB: loop body
LE: loop exit
PB: predicated region body
PF: predicated region fallthrough
CT: control target
= control target key end

     0   :  { %12 = vsyncpa [#allocation3], 0  ;;  %s731_s0 = inlined_call_operand.hbm [shape: f32[16,128], index: 0, kind: input, shape index: {}]   ;;  %s732_s1 = inlined_call_operand.vmem [shape: f32[1,128], index: 1, kind: input, shape index: {}]   ;;  %s733_s2 = inlined_call_operand.vmem [shape: f32[1,128], index: 2, kind: input, shape index: {}]   ;;  %s734_s3 = inlined_call_operand.hbm [shape: bf16[128,128], index: 3, kind: input, shape index: {}]   ;;  %s735_s4 = inlined_call_operand.vmem [shape: f32[1,128], index: 4, kind: input, shape index: {}]   ;;  %s736_s5 = inlined_call_operand.hbm [shape: bf16[128,128], index: 5, kind: input, shape index: {}]   ;;  %s737_s6 = inlined_call_operand.vmem [shape: f32[1,128], index: 6, kind: input, shape index: {}]   ;;  %s738_s7 = inlined_call_operand.hbm [shape: f32[16,128], index: 7, kind: output, shape index: {}]  }
   0x1   :  { %13 = vsyncpa [#allocation6], 0 }
   0x2   :  { %14 = vsyncpa [#allocation4], 0  ;;  %s579_s24 = smov [#allocation5]   ;;  %s485_s28 = scalar_lea.hbm %s734_s3, 1024 }
   0x3   :  { %s36_s25 = sshll.u32 %s579_s24, 4  ;;  %p486_p0 = scmp.ne.s32.totalorder %s734_s3, %s485_s28  ;;  %s37_s25 = int_to_ptr.vmem [resolvable:$true] %s36_s25 }
   0x4   :  { %p489_p1 = scmp.lt.u32.totalorder %s485_s28, %s734_s3 }
   0x6   :  { %p491_p2 = pnand %p489_p1, %p486_p0 }
   0x8   :  { %494 = shalt.err (!%p491_p2)
}
   0x9   :  { %s495_s10 = scalar_lea.vmem %s37_s25, 1024  ;;  %p500_p4 = scmp.lt.s32.totalorder %s37_s25, %s37_s25 }
   0xa   :  { %p496_p3 = scmp.ne.s32.totalorder %s37_s25, %s495_s10  ;;  %p501_p5 = scmp.lt.s32.totalorder %s495_s10, %s495_s10 }
   0xc   :  { %p502_p6 = por %p501_p5, %p500_p4 }
   0xe   :  { %p503_p7 = pnand %p502_p6, %p496_p3 }
  0x10   :  { %506 = shalt.err (!%p503_p7)
}
  0x11   :  { %s580_s11 = smov 64   ;;  %s581_s12 = smov 4  }
  0x12   :  { %42 = dma.hbm_to_vmem [thread:$0]  %s734_s3, 1024, %s37_s25, [#allocation6], %s580_s11, %s580_s11, %s581_s12  }
  0x13   :  { %s582_s15 = smov [#allocation2]   ;;  %s507_s19 = scalar_lea.hbm %s731_s0, 256 }
  0x14   :  { %s20_s16 = sshll.u32 %s582_s15, 4  ;;  %p508_p8 = scmp.ne.s32.totalorder %s731_s0, %s507_s19  ;;  %s21_s16 = int_to_ptr.vmem [resolvable:$true] %s20_s16 }
  0x15   :  { %p511_p9 = scmp.lt.u32.totalorder %s507_s19, %s731_s0 }
  0x17   :  { %p513_p10 = pnand %p511_p9, %p508_p8 }
  0x19   :  { %516 = shalt.err (!%p513_p10)
}
  0x1a   :  { %s517_s24 = scalar_lea.vmem %s21_s16, 256  ;;  %p522_p12 = scmp.lt.s32.totalorder %s21_s16, %s21_s16 }
  0x1b   :  { %p518_p11 = scmp.ne.s32.totalorder %s21_s16, %s517_s24  ;;  %p523_p13 = scmp.lt.s32.totalorder %s517_s24, %s517_s24 }
  0x1d   :  { %p524_p0 = por %p523_p13, %p522_p12 }
  0x1f   :  { %p525_p1 = pnand %p524_p0, %p518_p11 }
  0x21   :  { %528 = shalt.err (!%p525_p1)
}
  0x22   :  { %s583_s3 = smov 128   ;;  %s584_s25 = smov 8  }
  0x23   :  { %26 = dma.hbm_to_vmem [thread:$0]  %s731_s0, 256, %s21_s16, [#allocation3], %s583_s3, %s583_s3, %s584_s25  }
  0x24   :  { %s585_s28 = smov [#allocation7]   ;;  %s529_s9 = scalar_lea.hbm %s736_s5, 1024 }
  0x25   :  { %s50_s29 = sshll.u32 %s585_s28, 4  ;;  %p530_p2 = scmp.ne.s32.totalorder %s736_s5, %s529_s9  ;;  %s51_s29 = int_to_ptr.vmem [resolvable:$true] %s50_s29 }
  0x26   :  { %p533_p3 = scmp.lt.u32.totalorder %s529_s9, %s736_s5 }
  0x28   :  { %p535_p4 = pnand %p533_p3, %p530_p2 }
  0x2a   :  { %538 = shalt.err (!%p535_p4)
}
  0x2b   :  { %s539_s17 = scalar_lea.vmem %s51_s29, 1024  ;;  %p544_p6 = scmp.lt.s32.totalorder %s51_s29, %s51_s29 }
  0x2c   :  { %p540_p5 = scmp.ne.s32.totalorder %s51_s29, %s539_s17  ;;  %p545_p7 = scmp.lt.s32.totalorder %s539_s17, %s539_s17 }
  0x2e   :  { %p546_p8 = por %p545_p7, %p544_p6 }
  0x30   :  { %p547_p9 = pnand %p546_p8, %p540_p5 }
  0x32   :  { %550 = shalt.err (!%p547_p9)
}
  0x33   :  { %56 = dma.hbm_to_vmem [thread:$0]  %s736_s5, 1024, %s51_s29, [#allocation6], %s580_s11, %s580_s11, %s581_s12  }
  0x34   :  { %573 = dma.done.wait [#allocation3], 256  }
  0x35   :  { %574 = vsyncadd [#allocation3], 4294967040 }
  0x36   :  { %575 = dma.done.wait [#allocation6], 2048  }
  0x37   :  { %576 = vsyncadd [#allocation6], 4294965248  ;;  %v674_v0 = vld [vmem:[#allocation2] sm:$0xff]  ;;  %v676_v1 = vld [vmem:[#allocation2 + $0x8] sm:$0xff]  ;;  %v586_v5 = vmov 0.0   ;;  %vm587_vm0 = vmmov 0  }
  0x38   :  { %71 = vadd.xlane.f32.xlu0 %v674_v0  ;;  %v75_v2 = vmul.f32 %v674_v0, %v674_v0  ;;  %v76_v3 = vmul.f32 %v676_v1, %v676_v1  ;;  %v461_v4 = vld [vmem:[#allocation5] sm:$0xff]   ;;  %411 = vmatprep.subr.bf16.mxu0 %v586_v5  ;;  %v462_v6 = vld [vmem:[#allocation5 + $0x8] sm:$0xff]   ;;  %v463_v7 = vld [vmem:[#allocation5 + $0x10] sm:$0xff]   ;;  %s588_s20 = smov [#allocation8]  }
  0x39   :  { %431 = vmatprep.subr.bf16.mxu1 %v586_v5  ;;  %412 = vmatpush3.bf16.msra.mxu0 %v461_v4  ;;  %v464_v8 = vld [vmem:[#allocation5 + $0x18] sm:$0xff]   ;;  %v465_v9 = vld [vmem:[#allocation5 + $0x20] sm:$0xff]   ;;  %v466_v10 = vld [vmem:[#allocation5 + $0x28] sm:$0xff]   ;;  %s360_s21 = sshll.u32 %s588_s20, 4  ;;  %s361_s21 = int_to_ptr.vmem [resolvable:$true] %s360_s21 }
  0x3a   :  { %77 = vadd.xlane.f32.xlu1 %v75_v2  ;;  %413 = vmatprep.subr.bf16.mxu0 %v586_v5  ;;  %v467_v11 = vld [vmem:[#allocation5 + $0x30] sm:$0xff]   ;;  %v468_v12 = vld [vmem:[#allocation5 + $0x38] sm:$0xff]   ;;  %v469_v13 = vld [vmem:[#allocation7] sm:$0xff]   ;;  %s551_s22 = scalar_lea.vmem %s361_s21, 256  ;;  %p556_p11 = scmp.lt.s32.totalorder %s361_s21, %s361_s21 }
  0x3b   :  { %427 = vmatprep.mubr.msk.bf16.mxu0 %vm587_vm0, %v586_v5  ;;  %447 = vmatprep.mubr.msk.bf16.mxu1 %vm587_vm0, %v586_v5  ;;  %v470_v14 = vld [vmem:[#allocation7 + $0x8] sm:$0xff]   ;;  %v373_v34 = vld [vmem:[%s732_s1] ss:$0 sm:$0xff]  ;;  %v472_v45 = vld [vmem:[#allocation7 + $0x18] sm:$0xff]   ;;  %p552_p10 = scmp.ne.s32.totalorder %s361_s21, %s551_s22  ;;  %p557_p12 = scmp.lt.s32.totalorder %s551_s22, %s551_s22 }
  0x3c   :  { %73 = vadd.xlane.f32.xlu0 %v676_v1  ;;  %432 = vmatpush3.bf16.msra.mxu1 %v469_v13  ;;  %v374_v39 = vld [vmem:[%s733_s2] ss:$0 sm:$0xff]  ;;  %v473_v46 = vld [vmem:[#allocation7 + $0x20] sm:$0xff]   ;;  %v474_v47 = vld [vmem:[#allocation7 + $0x28] sm:$0xff]  }
  0x3d   :  { %414 = vmatpush3.bf16.msra.mxu0 %v462_v6  ;;  %433 = vmatprep.subr.bf16.mxu1 %v586_v5  ;;  %v471_v44 = vld [vmem:[#allocation7 + $0x10] sm:$0xff]   ;;  %v476_v49 = vld [vmem:[#allocation7 + $0x38] sm:$0xff]   ;;  %p558_p13 = por %p557_p12, %p556_p11 }
  0x3e   :  { %79 = vadd.xlane.f32.xlu1 %v76_v3  ;;  %415 = vmatprep.subr.bf16.mxu0 %v586_v5  ;;  %v475_v48 = vld [vmem:[#allocation7 + $0x30] sm:$0xff]  }
  0x3f   :  { %v375_v50 = vld [vmem:[%s735_s4] ss:$0 sm:$0xff]  ;;  %p559_p0 = pnand %p558_p13, %p552_p10 }
  0x40   :  { %434 = vmatpush3.bf16.msra.mxu1 %v470_v14  ;;  %v384_v4 = vld [vmem:[%s737_s6] ss:$0 sm:$0xff] }
  0x41   :  { %416 = vmatpush3.bf16.msra.mxu0 %v463_v7  ;;  %435 = vmatprep.subr.bf16.mxu1 %v586_v5 }
  0x42   :  { %417 = vmatprep.subr.bf16.mxu0 %v586_v5 }
  0x44   :  { %436 = vmatpush3.bf16.msra.mxu1 %v471_v44 }
  0x45   :  { %418 = vmatpush3.bf16.msra.mxu0 %v464_v8  ;;  %437 = vmatprep.subr.bf16.mxu1 %v586_v5 }
  0x46   :  { %419 = vmatprep.subr.bf16.mxu0 %v586_v5 }
  0x48   :  { %438 = vmatpush3.bf16.msra.mxu1 %v472_v45 }
  0x49   :  { %420 = vmatpush3.bf16.msra.mxu0 %v465_v9  ;;  %439 = vmatprep.subr.bf16.mxu1 %v586_v5 }
  0x4a   :  { %421 = vmatprep.subr.bf16.mxu0 %v586_v5 }
  0x4c   :  { %440 = vmatpush3.bf16.msra.mxu1 %v473_v46 }
  0x4d   :  { %422 = vmatpush3.bf16.msra.mxu0 %v466_v10  ;;  %441 = vmatprep.subr.bf16.mxu1 %v586_v5 }
  0x4e   :  { %423 = vmatprep.subr.bf16.mxu0 %v586_v5 }
  0x50   :  { %442 = vmatpush3.bf16.msra.mxu1 %v474_v47 }
  0x51   :  { %424 = vmatpush3.bf16.msra.mxu0 %v467_v11  ;;  %443 = vmatprep.subr.bf16.mxu1 %v586_v5 }
  0x52   :  { %425 = vmatprep.subr.bf16.mxu0 %v586_v5 }
  0x54   :  { %444 = vmatpush3.bf16.msra.mxu1 %v475_v48 }
  0x55   :  { %426 = vmatpush3.bf16.msra.mxu0 %v468_v12  ;;  %445 = vmatprep.subr.bf16.mxu1 %v586_v5 }
  0x58   :  { %446 = vmatpush3.bf16.msra.mxu1 %v476_v49 }
  0xc5   :  { %v72_v15 = vpop.xlane.xlu0 %71 }
  0xc6   :  { %v81_v16 = vmul.f32 0.03125, %v72_v15 }
  0xc7   :  { %v78_v17 = vpop.xlane.xlu1 %77 }
  0xc8   :  { %v85_v18 = vmul.f32 %v81_v16, %v81_v16  ;;  %v83_v19 = vmul.f32 0.03125, %v78_v17  ;;  %v91_v31 = vsub.f32 %v674_v0, %v81_v16 }
  0xc9   :  { %v74_v20 = vpop.xlane.xlu0 %73 }
  0xca   :  { %v87_v21 = vsub.f32 %v83_v19, %v85_v18  ;;  %v82_v22 = vmul.f32 0.03125, %v74_v20 }
  0xcb   :  { %v80_v23 = vpop.xlane.xlu1 %79 }
  0xcc   :  { %v89_v24 = vmax.f32 %v87_v21, 0.0  ;;  %v86_v25 = vmul.f32 %v82_v22, %v82_v22  ;;  %v84_v26 = vmul.f32 0.03125, %v80_v23  ;;  %v92_v35 = vsub.f32 %v676_v1, %v82_v22 }
  0xce   :  { %v93_v27 = vadd.f32 1e-05, %v89_v24  ;;  %v88_v28 = vsub.f32 %v84_v26, %v86_v25 }
  0xd0   :  { %477 = vrsqrt.f32 %v93_v27  ;;  %v90_v29 = vmax.f32 %v88_v28, 0.0 }
  0xd2   :  { %v94_v30 = vadd.f32 1e-05, %v90_v29 }
  0xd4   :  { %479 = vrsqrt.f32 %v94_v30 }
  0xda   :  { %v478_v32 = vpop.eup %477 }
  0xdb   :  { %v97_v33 = vmul.f32 %v478_v32, %v91_v31 }
  0xdd   :  { %v106_v38 = vmul.f32 %v373_v34, %v97_v33 }
  0xde   :  { %v480_v36 = vpop.eup %479 }
  0xdf   :  { %v98_v37 = vmul.f32 %v480_v36, %v92_v35  ;;  %v115_v41 = vadd.f32 %v374_v39, %v106_v38 }
  0xe1   :  { %v107_v40 = vmul.f32 %v373_v34, %v98_v37 }
  0xe3   :  { %v116_v42 = vadd.f32 %v374_v39, %v107_v40 }
  0xe5   :  { %v117_v43 = vpack.c.bf16 %v116_v42, %v115_v41 }
  0xe7   :  { %428 = vmatmul.mubr.bf16.vlgmr.msra.gmra.mrb[0].mxu0 %v117_v43 }
 0x1ba   :  { %v223_v51 = vpop.f32.mrb[0].mxu0 }
 0x1bb   :  { %v224_v52 = vadd.f32 %v375_v50, %v223_v51  ;;  %v429_v53 = vpop.f32.mrb[1].mxu0 }
 0x1bc   :  { %v226_v54 = vpop.f32.mrb[2].mxu0 }
 0x1bd   :  { %v232_v55 = vmul.f32 0.70710677, %v224_v52  ;;  %v227_v56 = vadd.f32 %v375_v50, %v226_v54  ;;  %v430_v57 = vpop.f32.mrb[3].mxu0  ;;  %v230_v62 = vmul.f32 0.5, %v224_v52 }
 0x1bf   :  { %481 = verf.f32 %v232_v55  ;;  %v233_v58 = vmul.f32 0.70710677, %v227_v56  ;;  %v231_v63 = vmul.f32 0.5, %v227_v56 }
 0x1c1   :  { %483 = verf.f32 %v233_v58 }
 0x1c9   :  { %v482_v59 = vpop.eup %481 }
 0x1ca   :  { %v236_v60 = vadd.f32 1.0, %v482_v59 }
 0x1cb   :  { %v484_v61 = vpop.eup %483 }
 0x1cc   :  { %v237_v0 = vadd.f32 1.0, %v484_v61  ;;  %v238_v1 = vmul.f32 %v236_v60, %v230_v62 }
 0x1ce   :  { %v239_v2 = vmul.f32 %v237_v0, %v231_v63 }
 0x1d0   :  { %v240_v3 = vpack.c.bf16 %v239_v2, %v238_v1 }
 0x1d2   :  { %448 = vmatmul.mubr.bf16.vlgmr.msra.gmra.mrb[0].mxu1 %v240_v3 }
 0x2a5   :  { %v346_v5 = vpop.f32.mrb[0].mxu1 }
 0x2a6   :  { %v347_v6 = vadd.f32 %v384_v4, %v346_v5  ;;  %v449_v7 = vpop.f32.mrb[1].mxu1 }
 0x2a7   :  { %v349_v8 = vpop.f32.mrb[2].mxu1 }
 0x2a8   :  { %353 = vst [vmem:[#allocation8] sm:$0xff] %v347_v6  ;;  %v350_v9 = vadd.f32 %v384_v4, %v349_v8  ;;  %v450_v10 = vpop.f32.mrb[3].mxu1 }
 0x2aa   :  { %354 = vst [vmem:[#allocation8 + $0x8] sm:$0xff] %v350_v9 }
 0x2ab   :  { %562 = shalt.err (!%p559_p0)
}
 0x2ac   :  { %s563_s24 = scalar_lea.hbm %s738_s7, 256 }
 0x2ad   :  { %p564_p1 = scmp.ne.s32.totalorder %s738_s7, %s563_s24  ;;  %p567_p2 = scmp.lt.u32.totalorder %s563_s24, %s738_s7 }
 0x2af   :  { %p569_p3 = pnand %p567_p2, %p564_p1 }
 0x2b1   :  { %572 = shalt.err (!%p569_p3)
}
 0x2b2   :  { %366 = dma.vmem_to_hbm [thread:$0]  %s361_s21, 256, %s738_s7, [#allocation4], %s583_s3, %s583_s3, %s584_s25  }
 0x2b3   :  { %577 = dma.done.wait [#allocation4], 256  }
 0x2b4   :  { %578 = vsyncadd [#allocation4], 4294967040 }
 0x2b5   :  { %370 = vsyncpa [#allocation3], 1 }
 0x2b6   :  { %371 = vsyncpa [#allocation6], 1 }
 0x2b7   :  { %372 = vsyncpa [#allocation4], 1 }

</bundles_post_ra>
